<compile_context>
chip_gen: v7x
topology: tpu7x:2x2x1
jax: 0.10.0
libtpu: 0.0.40
codegen_flags: <defaults>
</compile_context>

<pallas_src>
import functools
import numpy as np
import jax
import jax.numpy as jnp
from jax.experimental import pallas as pl
from jax.experimental.pallas import tpu as pltpu

D_MODEL = 32
NUM_HEADS = 2
D_K = D_MODEL // NUM_HEADS
FF_DIM = 128
NUM_ANSWERS = 2
LANE = 128                       # lane-dense classifier output width (sliced in wrapper)
_VMEM_BUDGET = 24 << 20          # target live-set per grid step (v7x-safe)
_VMEM_LIMIT_BYTES = 48 * 1024 * 1024   # raise scoped VMEM (v5e default is 16 MiB)


def _layernorm(x, g, b, eps):
    mu = jnp.mean(x, axis=-1, keepdims=True)
    var = jnp.mean(jnp.square(x - mu), axis=-1, keepdims=True)
    return (x - mu) * jax.lax.rsqrt(var + eps) * g + b


def transformer_kernel(x_ref, elng_ref, elnb_ref,
                       wqkvh_ref, bh_ref,
                       ln1g_ref, ln1b_ref, ln2g_ref, ln2b_ref,
                       w1_ref, b1_ref, w2_ref, b2_ref,
                       wd_ref, bd_ref, out_ref):
    TB, S, D = x_ref.shape
    N = TB * S
    bf = jnp.bfloat16
    f32 = jnp.float32

    # ---- Embeddings.layer_norm (eps=1e-12); x arrives bf16, math in f32 ----
    x2d = _layernorm(x_ref[...].astype(f32).reshape(N, D),
                     elng_ref[...], elnb_ref[...], 1e-12)

    # ---- fused projection: (N,32) @ (32,128) = [Q/sqrt(dk) | K | V@Wh_0 | V@Wh_1]
    # One MXU call with a fully lane-dense 128-wide output.
    qkvh = jnp.dot(x2d.astype(bf), wqkvh_ref[...],
                   preferred_element_type=f32).astype(bf)

    def lanes3d(col, width):
        return qkvh[:, col:col + width].reshape(TB, S, width)

    # ---- 2-head self-attention.  Wh is pre-folded into V, so each head's
    # context is already projected to d_model; heads simply sum.
    # NOTE: the reference module applies no padding mask, so none is applied
    # here (and S is never padded by the wrapper).
    attn = None
    for h in range(NUM_HEADS):                           # static 2-iteration loop
        qh = lanes3d(h * D_K, D_K)                       # (TB,S,16), 1/sqrt(dk) folded
        kh = lanes3d(D + h * D_K, D_K)                   # (TB,S,16)
        vproj = lanes3d(2 * D + h * D, D)                # (TB,S,32)  = V_h @ Wh_h
        scores = jnp.einsum('bqe,bke->bqk', qh, kh,
                            preferred_element_type=f32)  # (TB,S,S) f32
        scores = scores - jnp.max(scores, axis=-1, keepdims=True)
        e = jnp.exp(scores)
        a = e * pl.reciprocal(jnp.sum(e, axis=-1, keepdims=True), approx=False)
        ctx = jnp.einsum('bqk,bke->bqe', a.astype(bf), vproj,
                         preferred_element_type=f32)     # (TB,S,32) f32
        attn = ctx if attn is None else attn + ctx
    attn2d = attn.reshape(N, D) + bh_ref[...]

    # ---- residual + LayerNorm1 (eps=1e-6) ----
    out1 = _layernorm(x2d + attn2d, ln1g_ref[...], ln1b_ref[...], 1e-6)

    # ---- "CNN" block: d_model -> ff -> d_model with ReLU ----
    hid = jnp.dot(out1.astype(bf), w1_ref[...],
                  preferred_element_type=f32) + b1_ref[...]
    hid = jnp.maximum(hid, 0.0)
    ffn = jnp.dot(hid.astype(bf), w2_ref[...],
                  preferred_element_type=f32) + b2_ref[...]

    # ---- residual + LayerNorm2 (eps=1e-6) ----
    out2 = _layernorm(out1 + ffn, ln2g_ref[...], ln2b_ref[...], 1e-6)

    # ---- torch.max over seq dim, then final dense (lane-padded to 128) ----
    pooled = jnp.max(out2.reshape(TB, S, D), axis=1)     # (TB, D)
    logits = jnp.dot(pooled.astype(bf), wd_ref[...],
                     preferred_element_type=f32) + bd_ref[...]
    out_ref[...] = logits                                # (TB, 128) lane-dense store


def _choose_batch_tile(batch, seq):
    """Pick TB: largest multiple of 8 (<=512) whose per-step working set fits a
    ~24 MiB budget (headroom under v7x's 32 MiB scoped / 64 MiB physical VMEM),
    then reduced so the grid has >= 2 steps when the batch allows it (v7x has
    2 TensorCores and the 'parallel' batch axis shards the grid across them)."""
    if batch <= 8:
        return batch                       # single tiny tile, no batch padding

    def vmem_est(tb):
        n = tb * seq
        return (n * ((4 + 2) * 4 * D_MODEL          # fused qkvh: f32 + bf16 copy
                     + (4 + 2) * FF_DIM             # ffn hidden: f32 + bf16 copy
                     + 12 * 4 * D_MODEL)            # ~12 f32 (n,32) temporaries
                + NUM_HEADS * 3 * 4 * tb * seq * seq   # scores/exp/probs, f32 (conservative)
                + 2 * 2 * n * D_MODEL               # double-buffered bf16 x tile
                + 2 * 4 * tb * LANE)                # double-buffered f32 out tile

    tb = 8
    for cand in (16, 32, 64, 128, 256, 512):
        if vmem_est(cand) <= _VMEM_BUDGET:
            tb = cand
    batch_pad8 = -(-batch // 8) * 8
    while tb > 8 and 2 * tb > batch_pad8:   # keep >= 2 grid steps for v7x megacore
        tb //= 2
    return tb


def make_sinusoidal_pos_emb(max_pos, d_model):
    theta = np.array([[p / np.power(10000, 2 * (j // 2) / d_model)
                       for j in range(d_model)] for p in range(max_pos)])
    pp = np.zeros((max_pos, d_model), dtype=np.float32)
    pp[:, 0::2] = np.sin(theta[:, 0::2])
    pp[:, 1::2] = np.cos(theta[:, 1::2])
    return jnp.asarray(pp)


def init_params(key, vocab_size, max_pos):
    ks = jax.random.split(key, 12)

    def lin_w(k, fan_in, fan_out):
        bound = 1.0 / np.sqrt(fan_in)
        return jax.random.uniform(k, (fan_in, fan_out), jnp.float32, -bound, bound)

    def lin_b(k, fan_in, fan_out):
        bound = 1.0 / np.sqrt(fan_in)
        return jax.random.uniform(k, (1, fan_out), jnp.float32, -bound, bound)

    word_emb = jax.random.normal(ks[0], (vocab_size, D_MODEL), jnp.float32)
    word_emb = word_emb.at[1].set(0.0)   # padding_idx=1 row is zero

    return dict(
        word_emb=word_emb,
        pos_emb=make_sinusoidal_pos_emb(max_pos, D_MODEL),
        eln_g=jnp.ones((1, D_MODEL), jnp.float32),
        eln_b=jnp.zeros((1, D_MODEL), jnp.float32),
        wq=lin_w(ks[1], D_MODEL, D_MODEL),
        wk=lin_w(ks[2], D_MODEL, D_MODEL),
        wv=lin_w(ks[3], D_MODEL, D_MODEL),
        wh=lin_w(ks[4], D_MODEL, D_MODEL),
        bh=lin_b(ks[5], D_MODEL, D_MODEL),
        ln1_g=jnp.ones((1, D_MODEL), jnp.float32),
        ln1_b=jnp.zeros((1, D_MODEL), jnp.float32),
        ln2_g=jnp.ones((1, D_MODEL), jnp.float32),
        ln2_b=jnp.zeros((1, D_MODEL), jnp.float32),
        w1=lin_w(ks[6], D_MODEL, FF_DIM),
        b1=lin_b(ks[7], D_MODEL, FF_DIM),
        w2=lin_w(ks[8], FF_DIM, D_MODEL),
        b2=lin_b(ks[9], FF_DIM, D_MODEL),
        wd=lin_w(ks[10], D_MODEL, NUM_ANSWERS),
        bd=lin_b(ks[11], D_MODEL, NUM_ANSWERS),
    )


@jax.jit
def transformer_classifier(input_ids, params):
    B, S = input_ids.shape
    TB = _choose_batch_tile(B, S)
    B_pad = -(-B // TB) * TB
    if B_pad != B:   # pad with padding_idx=1 rows; sliced off after the kernel
        input_ids = jnp.pad(input_ids, ((0, B_pad - B), (0, 0)), constant_values=1)

    # Embedding gathers (glue, outside the kernel); stream x into the kernel as
    # bf16 (halves the only batch-scaled HBM read), upcast in-kernel before LN.
    word = jnp.take(params['word_emb'], input_ids, axis=0)             # (B_pad,S,D)
    x = (word + params['pos_emb'][:S][None, :, :]).astype(jnp.bfloat16)

    # Precondition weights:
    #  * fold 1/sqrt(d_k) into Wq,
    #  * fold the head output projection Wh into V: Wvh_h = Wv[:,h*16:] @ Wh[h*16:,:],
    #  * fuse into one (32,128) lane-dense MXU weight [Wq' | Wk | Wvh0 | Wvh1],
    #  * cast MXU weight operands to bf16 (f32 accumulation in-kernel),
    #  * lane-pad the classifier head to 128 lanes.
    bf = jnp.bfloat16
    wq, wk, wv, wh = params['wq'], params['wk'], params['wv'], params['wh']
    wvh = [wv[:, h * D_K:(h + 1) * D_K] @ wh[h * D_K:(h + 1) * D_K, :]
           for h in range(NUM_HEADS)]
    wqkvh = jnp.concatenate([wq * (1.0 / np.sqrt(D_K)), wk] + wvh,
                            axis=1).astype(bf)                         # (32, 128)
    wd_pad = jnp.zeros((D_MODEL, LANE), jnp.float32
                       ).at[:, :NUM_ANSWERS].set(params['wd']).astype(bf)
    bd_pad = jnp.zeros((1, LANE), jnp.float32
                       ).at[:, :NUM_ANSWERS].set(params['bd'])

    args = (x, params['eln_g'], params['eln_b'],
            wqkvh, params['bh'],
            params['ln1_g'], params['ln1_b'], params['ln2_g'], params['ln2_b'],
            params['w1'].astype(bf), params['b1'],
            params['w2'].astype(bf), params['b2'],
            wd_pad, bd_pad)

    const = lambda i: (0, 0)
    in_specs = [
        pl.BlockSpec((TB, S, D_MODEL), lambda i: (i, 0, 0)),  # x: streamed per tile
        pl.BlockSpec((1, D_MODEL), const),                    # eln_g
        pl.BlockSpec((1, D_MODEL), const),                    # eln_b
        pl.BlockSpec((D_MODEL, 4 * D_MODEL), const),          # wqkvh (32,128)
        pl.BlockSpec((1, D_MODEL), const),                    # bh
        pl.BlockSpec((1, D_MODEL), const),                    # ln1_g
        pl.BlockSpec((1, D_MODEL), const),                    # ln1_b
        pl.BlockSpec((1, D_MODEL), const),                    # ln2_g
        pl.BlockSpec((1, D_MODEL), const),                    # ln2_b
        pl.BlockSpec((D_MODEL, FF_DIM), const),               # w1
        pl.BlockSpec((1, FF_DIM), const),                     # b1
        pl.BlockSpec((FF_DIM, D_MODEL), const),               # w2
        pl.BlockSpec((1, D_MODEL), const),                    # b2
        pl.BlockSpec((D_MODEL, LANE), const),                 # wd (lane-padded)
        pl.BlockSpec((1, LANE), const),                       # bd (lane-padded)
    ]

    logits_pad = pl.pallas_call(
        transformer_kernel,
        out_shape=jax.ShapeDtypeStruct((B_pad, LANE), jnp.float32),
        grid=(B_pad // TB,),
        in_specs=in_specs,
        out_specs=pl.BlockSpec((TB, LANE), lambda i: (i, 0)),
        compiler_params=pltpu.CompilerParams(
            dimension_semantics=("parallel",),
            vmem_limit_bytes=_VMEM_LIMIT_BYTES),
    )(*args)

    return logits_pad[:B, :NUM_ANSWERS]


if __name__ == "__main__":
    key = jax.random.PRNGKey(0)
    k_ids, k_params = jax.random.split(key)

    B, S = 2, 8
    VOCAB = 100          # small stand-in for input_vocab_size=50002
    MAX_POS = 64         # small stand-in for max_position_embeddings=10000

    input_ids = jax.random.randint(k_ids, (B, S), 0, VOCAB, dtype=jnp.int32)
    params = init_params(k_params, VOCAB, MAX_POS)

    out = transformer_classifier(input_ids, params)
    out = jax.block_until_ready(out)
    assert out.shape == (B, NUM_ANSWERS) and out.dtype == jnp.float32
    print("KERNEL_OK")
</pallas_src>

<mosaic_0001>
module attributes {stable_mosaic.version = 11 : i64} {
  func.func @transformer_kernel(%arg0: i32, %arg1: memref<2x8x32xbf16, #tpu.memory_space<vmem>>, %arg2: memref<1x32xf32, #tpu.memory_space<vmem>>, %arg3: memref<1x32xf32, #tpu.memory_space<vmem>>, %arg4: memref<32x128xbf16, #tpu.memory_space<vmem>>, %arg5: memref<1x32xf32, #tpu.memory_space<vmem>>, %arg6: memref<1x32xf32, #tpu.memory_space<vmem>>, %arg7: memref<1x32xf32, #tpu.memory_space<vmem>>, %arg8: memref<1x32xf32, #tpu.memory_space<vmem>>, %arg9: memref<1x32xf32, #tpu.memory_space<vmem>>, %arg10: memref<32x128xbf16, #tpu.memory_space<vmem>>, %arg11: memref<1x128xf32, #tpu.memory_space<vmem>>, %arg12: memref<128x32xbf16, #tpu.memory_space<vmem>>, %arg13: memref<1x32xf32, #tpu.memory_space<vmem>>, %arg14: memref<32x128xbf16, #tpu.memory_space<vmem>>, %arg15: memref<1x128xf32, #tpu.memory_space<vmem>>, %arg16: memref<2x128xf32, #tpu.memory_space<vmem>>) attributes {dimension_semantics = [#tpu.dimension_semantics<parallel>], iteration_bounds = array<i64: 1>, scalar_prefetch = 0 : i64, scratch_operands = 0 : i64, tpu.core_type = #tpu.core_type<tc>, window_params = [{transform_indices = @transform_0, window_bounds = array<i64: 2, 8, 32>}, {pipeline_mode = #tpu.pipeline_mode<synchronous>, transform_indices = @transform_1, window_bounds = array<i64: 1, 32>}, {pipeline_mode = #tpu.pipeline_mode<synchronous>, transform_indices = @transform_2, window_bounds = array<i64: 1, 32>}, {pipeline_mode = #tpu.pipeline_mode<synchronous>, transform_indices = @transform_3, window_bounds = array<i64: 32, 128>}, {pipeline_mode = #tpu.pipeline_mode<synchronous>, transform_indices = @transform_4, window_bounds = array<i64: 1, 32>}, {pipeline_mode = #tpu.pipeline_mode<synchronous>, transform_indices = @transform_5, window_bounds = array<i64: 1, 32>}, {pipeline_mode = #tpu.pipeline_mode<synchronous>, transform_indices = @transform_6, window_bounds = array<i64: 1, 32>}, {pipeline_mode = #tpu.pipeline_mode<synchronous>, transform_indices = @transform_7, window_bounds = array<i64: 1, 32>}, {pipeline_mode = #tpu.pipeline_mode<synchronous>, transform_indices = @transform_8, window_bounds = array<i64: 1, 32>}, {pipeline_mode = #tpu.pipeline_mode<synchronous>, transform_indices = @transform_9, window_bounds = array<i64: 32, 128>}, {pipeline_mode = #tpu.pipeline_mode<synchronous>, transform_indices = @transform_10, window_bounds = array<i64: 1, 128>}, {pipeline_mode = #tpu.pipeline_mode<synchronous>, transform_indices = @transform_11, window_bounds = array<i64: 128, 32>}, {pipeline_mode = #tpu.pipeline_mode<synchronous>, transform_indices = @transform_12, window_bounds = array<i64: 1, 32>}, {pipeline_mode = #tpu.pipeline_mode<synchronous>, transform_indices = @transform_13, window_bounds = array<i64: 32, 128>}, {pipeline_mode = #tpu.pipeline_mode<synchronous>, transform_indices = @transform_14, window_bounds = array<i64: 1, 128>}, {transform_indices = @transform_15, window_bounds = array<i64: 2, 128>}]} {
    %c0 = arith.constant 0 : index
    %c0_0 = arith.constant 0 : index
    %c0_1 = arith.constant 0 : index
    %0 = vector.load %arg1[%c0, %c0_0, %c0_1] : memref<2x8x32xbf16, #tpu.memory_space<vmem>>, vector<2x8x32xbf16>
    %1 = arith.extf %0 : vector<2x8x32xbf16> to vector<2x8x32xf32>
    %2 = vector.shape_cast %1 : vector<2x8x32xf32> to vector<16x32xf32>
    %c0_2 = arith.constant 0 : index
    %c0_3 = arith.constant 0 : index
    %3 = vector.load %arg2[%c0_2, %c0_3] : memref<1x32xf32, #tpu.memory_space<vmem>>, vector<1x32xf32>
    %c0_4 = arith.constant 0 : index
    %c0_5 = arith.constant 0 : index
    %4 = vector.load %arg3[%c0_4, %c0_5] : memref<1x32xf32, #tpu.memory_space<vmem>>, vector<1x32xf32>
    %cst = arith.constant dense<0.000000e+00> : vector<16xf32>
    %5 = vector.multi_reduction <add>, %2, %cst [1] : vector<16x32xf32> to vector<16xf32>
    %6 = vector.shape_cast %5 : vector<16xf32> to vector<16x1xf32>
    %cst_6 = arith.constant 3.200000e+01 : f32
    %7 = vector.broadcast %cst_6 : f32 to vector<16x1xf32>
    %8 = arith.divf %6, %7 : vector<16x1xf32>
    %9 = vector.broadcast %8 : vector<16x1xf32> to vector<16x32xf32>
    %10 = arith.subf %2, %9 : vector<16x32xf32>
    %11 = arith.mulf %10, %10 : vector<16x32xf32>
    %cst_7 = arith.constant dense<0.000000e+00> : vector<16xf32>
    %12 = vector.multi_reduction <add>, %11, %cst_7 [1] : vector<16x32xf32> to vector<16xf32>
    %13 = vector.shape_cast %12 : vector<16xf32> to vector<16x1xf32>
    %cst_8 = arith.constant 3.200000e+01 : f32
    %14 = vector.broadcast %cst_8 : f32 to vector<16x1xf32>
    %15 = arith.divf %13, %14 : vector<16x1xf32>
    %16 = vector.broadcast %8 : vector<16x1xf32> to vector<16x32xf32>
    %17 = arith.subf %2, %16 : vector<16x32xf32>
    %cst_9 = arith.constant 9.99999996E-13 : f32
    %18 = vector.broadcast %cst_9 : f32 to vector<16x1xf32>
    %19 = arith.addf %15, %18 : vector<16x1xf32>
    %20 = math.rsqrt %19 : vector<16x1xf32>
    %21 = vector.broadcast %20 : vector<16x1xf32> to vector<16x32xf32>
    %22 = arith.mulf %17, %21 : vector<16x32xf32>
    %23 = vector.broadcast %3 : vector<1x32xf32> to vector<16x32xf32>
    %24 = arith.mulf %22, %23 : vector<16x32xf32>
    %25 = vector.broadcast %4 : vector<1x32xf32> to vector<16x32xf32>
    %26 = arith.addf %24, %25 : vector<16x32xf32>
    %27 = arith.truncf %26 : vector<16x32xf32> to vector<16x32xbf16>
    %c0_10 = arith.constant 0 : index
    %c0_11 = arith.constant 0 : index
    %28 = vector.load %arg4[%c0_10, %c0_11] : memref<32x128xbf16, #tpu.memory_space<vmem>>, vector<32x128xbf16>
    %cst_12 = arith.constant dense<0.000000e+00> : vector<16x128xf32>
    %29 = tpu.matmul %27, %28, %cst_12 {dimension_numbers = #tpu.dot_dimension_numbers<[1], [0], [0], [1], [0, 0, 1, 1], [], []>} : vector<16x32xbf16>, vector<32x128xbf16>, vector<16x128xf32> -> vector<16x128xf32>
    %30 = arith.truncf %29 : vector<16x128xf32> to vector<16x128xbf16>
    %31 = vector.extract_strided_slice %30 {offsets = [0, 0], sizes = [16, 16], strides = [1, 1]} : vector<16x128xbf16> to vector<16x16xbf16>
    %32 = vector.shape_cast %31 : vector<16x16xbf16> to vector<2x8x16xbf16>
    %33 = vector.extract_strided_slice %30 {offsets = [0, 32], sizes = [16, 16], strides = [1, 1]} : vector<16x128xbf16> to vector<16x16xbf16>
    %34 = vector.shape_cast %33 : vector<16x16xbf16> to vector<2x8x16xbf16>
    %35 = vector.extract_strided_slice %30 {offsets = [0, 64], sizes = [16, 32], strides = [1, 1]} : vector<16x128xbf16> to vector<16x32xbf16>
    %36 = vector.shape_cast %35 : vector<16x32xbf16> to vector<2x8x32xbf16>
    "tpu.trace_start"() <{level = 10 : i32, message = "bqe,bke->bqk"}> : () -> ()
    %cst_13 = arith.constant dense<0.000000e+00> : vector<2x8x8xf32>
    %37 = tpu.matmul %32, %34, %cst_13 {dimension_numbers = #tpu.dot_dimension_numbers<[2], [2], [1], [1], [0, 0, 0, 1, 1, 1], [0], [0]>} : vector<2x8x16xbf16>, vector<2x8x16xbf16>, vector<2x8x8xf32> -> vector<2x8x8xf32>
    "tpu.trace_stop"() : () -> ()
    %cst_14 = arith.constant dense<0xFF800000> : vector<2x8xf32>
    %38 = vector.multi_reduction <maximumf>, %37, %cst_14 [2] : vector<2x8x8xf32> to vector<2x8xf32>
    %39 = vector.shape_cast %38 : vector<2x8xf32> to vector<2x8x1xf32>
    %40 = vector.broadcast %39 : vector<2x8x1xf32> to vector<2x8x8xf32>
    %41 = arith.subf %37, %40 : vector<2x8x8xf32>
    %42 = math.exp %41 : vector<2x8x8xf32>
    %cst_15 = arith.constant dense<0.000000e+00> : vector<2x8xf32>
    %43 = vector.multi_reduction <add>, %42, %cst_15 [2] : vector<2x8x8xf32> to vector<2x8xf32>
    %44 = vector.shape_cast %43 : vector<2x8xf32> to vector<2x8x1xf32>
    %45 = tpu.reciprocal %44 : vector<2x8x1xf32> -> vector<2x8x1xf32>
    %46 = vector.broadcast %45 : vector<2x8x1xf32> to vector<2x8x8xf32>
    %47 = arith.mulf %42, %46 : vector<2x8x8xf32>
    %48 = arith.truncf %47 : vector<2x8x8xf32> to vector<2x8x8xbf16>
    "tpu.trace_start"() <{level = 10 : i32, message = "bqk,bke->bqe"}> : () -> ()
    %cst_16 = arith.constant dense<0.000000e+00> : vector<2x8x32xf32>
    %49 = tpu.matmul %48, %36, %cst_16 {dimension_numbers = #tpu.dot_dimension_numbers<[2], [1], [1], [2], [0, 0, 0, 1, 1, 2], [0], [0]>} : vector<2x8x8xbf16>, vector<2x8x32xbf16>, vector<2x8x32xf32> -> vector<2x8x32xf32>
    "tpu.trace_stop"() : () -> ()
    %50 = vector.extract_strided_slice %30 {offsets = [0, 16], sizes = [16, 16], strides = [1, 1]} : vector<16x128xbf16> to vector<16x16xbf16>
    %51 = vector.shape_cast %50 : vector<16x16xbf16> to vector<2x8x16xbf16>
    %52 = vector.extract_strided_slice %30 {offsets = [0, 48], sizes = [16, 16], strides = [1, 1]} : vector<16x128xbf16> to vector<16x16xbf16>
    %53 = vector.shape_cast %52 : vector<16x16xbf16> to vector<2x8x16xbf16>
    %54 = vector.extract_strided_slice %30 {offsets = [0, 96], sizes = [16, 32], strides = [1, 1]} : vector<16x128xbf16> to vector<16x32xbf16>
    %55 = vector.shape_cast %54 : vector<16x32xbf16> to vector<2x8x32xbf16>
    "tpu.trace_start"() <{level = 10 : i32, message = "bqe,bke->bqk"}> : () -> ()
    %cst_17 = arith.constant dense<0.000000e+00> : vector<2x8x8xf32>
    %56 = tpu.matmul %51, %53, %cst_17 {dimension_numbers = #tpu.dot_dimension_numbers<[2], [2], [1], [1], [0, 0, 0, 1, 1, 1], [0], [0]>} : vector<2x8x16xbf16>, vector<2x8x16xbf16>, vector<2x8x8xf32> -> vector<2x8x8xf32>
    "tpu.trace_stop"() : () -> ()
    %cst_18 = arith.constant dense<0xFF800000> : vector<2x8xf32>
    %57 = vector.multi_reduction <maximumf>, %56, %cst_18 [2] : vector<2x8x8xf32> to vector<2x8xf32>
    %58 = vector.shape_cast %57 : vector<2x8xf32> to vector<2x8x1xf32>
    %59 = vector.broadcast %58 : vector<2x8x1xf32> to vector<2x8x8xf32>
    %60 = arith.subf %56, %59 : vector<2x8x8xf32>
    %61 = math.exp %60 : vector<2x8x8xf32>
    %cst_19 = arith.constant dense<0.000000e+00> : vector<2x8xf32>
    %62 = vector.multi_reduction <add>, %61, %cst_19 [2] : vector<2x8x8xf32> to vector<2x8xf32>
    %63 = vector.shape_cast %62 : vector<2x8xf32> to vector<2x8x1xf32>
    %64 = tpu.reciprocal %63 : vector<2x8x1xf32> -> vector<2x8x1xf32>
    %65 = vector.broadcast %64 : vector<2x8x1xf32> to vector<2x8x8xf32>
    %66 = arith.mulf %61, %65 : vector<2x8x8xf32>
    %67 = arith.truncf %66 : vector<2x8x8xf32> to vector<2x8x8xbf16>
    "tpu.trace_start"() <{level = 10 : i32, message = "bqk,bke->bqe"}> : () -> ()
    %cst_20 = arith.constant dense<0.000000e+00> : vector<2x8x32xf32>
    %68 = tpu.matmul %67, %55, %cst_20 {dimension_numbers = #tpu.dot_dimension_numbers<[2], [1], [1], [2], [0, 0, 0, 1, 1, 2], [0], [0]>} : vector<2x8x8xbf16>, vector<2x8x32xbf16>, vector<2x8x32xf32> -> vector<2x8x32xf32>
    "tpu.trace_stop"() : () -> ()
    %69 = arith.addf %49, %68 : vector<2x8x32xf32>
    %70 = vector.shape_cast %69 : vector<2x8x32xf32> to vector<16x32xf32>
    %c0_21 = arith.constant 0 : index
    %c0_22 = arith.constant 0 : index
    %71 = vector.load %arg5[%c0_21, %c0_22] : memref<1x32xf32, #tpu.memory_space<vmem>>, vector<1x32xf32>
    %72 = vector.broadcast %71 : vector<1x32xf32> to vector<16x32xf32>
    %73 = arith.addf %70, %72 : vector<16x32xf32>
    %74 = arith.addf %26, %73 : vector<16x32xf32>
    %c0_23 = arith.constant 0 : index
    %c0_24 = arith.constant 0 : index
    %75 = vector.load %arg6[%c0_23, %c0_24] : memref<1x32xf32, #tpu.memory_space<vmem>>, vector<1x32xf32>
    %c0_25 = arith.constant 0 : index
    %c0_26 = arith.constant 0 : index
    %76 = vector.load %arg7[%c0_25, %c0_26] : memref<1x32xf32, #tpu.memory_space<vmem>>, vector<1x32xf32>
    %cst_27 = arith.constant dense<0.000000e+00> : vector<16xf32>
    %77 = vector.multi_reduction <add>, %74, %cst_27 [1] : vector<16x32xf32> to vector<16xf32>
    %78 = vector.shape_cast %77 : vector<16xf32> to vector<16x1xf32>
    %cst_28 = arith.constant 3.200000e+01 : f32
    %79 = vector.broadcast %cst_28 : f32 to vector<16x1xf32>
    %80 = arith.divf %78, %79 : vector<16x1xf32>
    %81 = vector.broadcast %80 : vector<16x1xf32> to vector<16x32xf32>
    %82 = arith.subf %74, %81 : vector<16x32xf32>
    %83 = arith.mulf %82, %82 : vector<16x32xf32>
    %cst_29 = arith.constant dense<0.000000e+00> : vector<16xf32>
    %84 = vector.multi_reduction <add>, %83, %cst_29 [1] : vector<16x32xf32> to vector<16xf32>
    %85 = vector.shape_cast %84 : vector<16xf32> to vector<16x1xf32>
    %cst_30 = arith.constant 3.200000e+01 : f32
    %86 = vector.broadcast %cst_30 : f32 to vector<16x1xf32>
    %87 = arith.divf %85, %86 : vector<16x1xf32>
    %88 = vector.broadcast %80 : vector<16x1xf32> to vector<16x32xf32>
    %89 = arith.subf %74, %88 : vector<16x32xf32>
    %cst_31 = arith.constant 9.99999997E-7 : f32
    %90 = vector.broadcast %cst_31 : f32 to vector<16x1xf32>
    %91 = arith.addf %87, %90 : vector<16x1xf32>
    %92 = math.rsqrt %91 : vector<16x1xf32>
    %93 = vector.broadcast %92 : vector<16x1xf32> to vector<16x32xf32>
    %94 = arith.mulf %89, %93 : vector<16x32xf32>
    %95 = vector.broadcast %75 : vector<1x32xf32> to vector<16x32xf32>
    %96 = arith.mulf %94, %95 : vector<16x32xf32>
    %97 = vector.broadcast %76 : vector<1x32xf32> to vector<16x32xf32>
    %98 = arith.addf %96, %97 : vector<16x32xf32>
    %99 = arith.truncf %98 : vector<16x32xf32> to vector<16x32xbf16>
    %c0_32 = arith.constant 0 : index
    %c0_33 = arith.constant 0 : index
    %100 = vector.load %arg10[%c0_32, %c0_33] : memref<32x128xbf16, #tpu.memory_space<vmem>>, vector<32x128xbf16>
    %cst_34 = arith.constant dense<0.000000e+00> : vector<16x128xf32>
    %101 = tpu.matmul %99, %100, %cst_34 {dimension_numbers = #tpu.dot_dimension_numbers<[1], [0], [0], [1], [0, 0, 1, 1], [], []>} : vector<16x32xbf16>, vector<32x128xbf16>, vector<16x128xf32> -> vector<16x128xf32>
    %c0_35 = arith.constant 0 : index
    %c0_36 = arith.constant 0 : index
    %102 = vector.load %arg11[%c0_35, %c0_36] : memref<1x128xf32, #tpu.memory_space<vmem>>, vector<1x128xf32>
    %103 = vector.broadcast %102 : vector<1x128xf32> to vector<16x128xf32>
    %104 = arith.addf %101, %103 : vector<16x128xf32>
    %cst_37 = arith.constant 0.000000e+00 : f32
    %105 = vector.broadcast %cst_37 : f32 to vector<16x128xf32>
    %106 = arith.maximumf %104, %105 : vector<16x128xf32>
    %107 = arith.truncf %106 : vector<16x128xf32> to vector<16x128xbf16>
    %c0_38 = arith.constant 0 : index
    %c0_39 = arith.constant 0 : index
    %108 = vector.load %arg12[%c0_38, %c0_39] : memref<128x32xbf16, #tpu.memory_space<vmem>>, vector<128x32xbf16>
    %cst_40 = arith.constant dense<0.000000e+00> : vector<16x32xf32>
    %109 = tpu.matmul %107, %108, %cst_40 {dimension_numbers = #tpu.dot_dimension_numbers<[1], [0], [0], [1], [0, 0, 1, 1], [], []>} : vector<16x128xbf16>, vector<128x32xbf16>, vector<16x32xf32> -> vector<16x32xf32>
    %c0_41 = arith.constant 0 : index
    %c0_42 = arith.constant 0 : index
    %110 = vector.load %arg13[%c0_41, %c0_42] : memref<1x32xf32, #tpu.memory_space<vmem>>, vector<1x32xf32>
    %111 = vector.broadcast %110 : vector<1x32xf32> to vector<16x32xf32>
    %112 = arith.addf %109, %111 : vector<16x32xf32>
    %113 = arith.addf %98, %112 : vector<16x32xf32>
    %c0_43 = arith.constant 0 : index
    %c0_44 = arith.constant 0 : index
    %114 = vector.load %arg8[%c0_43, %c0_44] : memref<1x32xf32, #tpu.memory_space<vmem>>, vector<1x32xf32>
    %c0_45 = arith.constant 0 : index
    %c0_46 = arith.constant 0 : index
    %115 = vector.load %arg9[%c0_45, %c0_46] : memref<1x32xf32, #tpu.memory_space<vmem>>, vector<1x32xf32>
    %cst_47 = arith.constant dense<0.000000e+00> : vector<16xf32>
    %116 = vector.multi_reduction <add>, %113, %cst_47 [1] : vector<16x32xf32> to vector<16xf32>
    %117 = vector.shape_cast %116 : vector<16xf32> to vector<16x1xf32>
    %cst_48 = arith.constant 3.200000e+01 : f32
    %118 = vector.broadcast %cst_48 : f32 to vector<16x1xf32>
    %119 = arith.divf %117, %118 : vector<16x1xf32>
    %120 = vector.broadcast %119 : vector<16x1xf32> to vector<16x32xf32>
    %121 = arith.subf %113, %120 : vector<16x32xf32>
    %122 = arith.mulf %121, %121 : vector<16x32xf32>
    %cst_49 = arith.constant dense<0.000000e+00> : vector<16xf32>
    %123 = vector.multi_reduction <add>, %122, %cst_49 [1] : vector<16x32xf32> to vector<16xf32>
    %124 = vector.shape_cast %123 : vector<16xf32> to vector<16x1xf32>
    %cst_50 = arith.constant 3.200000e+01 : f32
    %125 = vector.broadcast %cst_50 : f32 to vector<16x1xf32>
    %126 = arith.divf %124, %125 : vector<16x1xf32>
    %127 = vector.broadcast %119 : vector<16x1xf32> to vector<16x32xf32>
    %128 = arith.subf %113, %127 : vector<16x32xf32>
    %cst_51 = arith.constant 9.99999997E-7 : f32
    %129 = vector.broadcast %cst_51 : f32 to vector<16x1xf32>
    %130 = arith.addf %126, %129 : vector<16x1xf32>
    %131 = math.rsqrt %130 : vector<16x1xf32>
    %132 = vector.broadcast %131 : vector<16x1xf32> to vector<16x32xf32>
    %133 = arith.mulf %128, %132 : vector<16x32xf32>
    %134 = vector.broadcast %114 : vector<1x32xf32> to vector<16x32xf32>
    %135 = arith.mulf %133, %134 : vector<16x32xf32>
    %136 = vector.broadcast %115 : vector<1x32xf32> to vector<16x32xf32>
    %137 = arith.addf %135, %136 : vector<16x32xf32>
    %138 = vector.shape_cast %137 : vector<16x32xf32> to vector<2x8x32xf32>
    %cst_52 = arith.constant dense<0xFF800000> : vector<2x32xf32>
    %139 = vector.multi_reduction <maximumf>, %138, %cst_52 [1] : vector<2x8x32xf32> to vector<2x32xf32>
    %140 = arith.truncf %139 : vector<2x32xf32> to vector<2x32xbf16>
    %c0_53 = arith.constant 0 : index
    %c0_54 = arith.constant 0 : index
    %141 = vector.load %arg14[%c0_53, %c0_54] : memref<32x128xbf16, #tpu.memory_space<vmem>>, vector<32x128xbf16>
    %cst_55 = arith.constant dense<0.000000e+00> : vector<2x128xf32>
    %142 = tpu.matmul %140, %141, %cst_55 {dimension_numbers = #tpu.dot_dimension_numbers<[1], [0], [0], [1], [0, 0, 1, 1], [], []>} : vector<2x32xbf16>, vector<32x128xbf16>, vector<2x128xf32> -> vector<2x128xf32>
    %c0_56 = arith.constant 0 : index
    %c0_57 = arith.constant 0 : index
    %143 = vector.load %arg15[%c0_56, %c0_57] : memref<1x128xf32, #tpu.memory_space<vmem>>, vector<1x128xf32>
    %144 = vector.broadcast %143 : vector<1x128xf32> to vector<2x128xf32>
    %145 = arith.addf %142, %144 : vector<2x128xf32>
    %c0_58 = arith.constant 0 : index
    %c0_59 = arith.constant 0 : index
    %146 = vector.load %arg16[%c0_58, %c0_59] : memref<2x128xf32, #tpu.memory_space<vmem>>, vector<2x128xf32>
    tpu.vector_store %arg16[%c0_58, %c0_59], %145 {strides = array<i32>} : memref<2x128xf32, #tpu.memory_space<vmem>>, vector<2x128xf32>,
    return
  }
  func.func @transform_0(%arg0: i32) -> (i32, i32, i32) {
    %c0_i32 = arith.constant 0 : i32
    %c0_i32_0 = arith.constant 0 : i32
    %c0_i32_1 = arith.constant 0 : i32
    return %arg0, %c0_i32, %c0_i32_0 : i32, i32, i32
  }
  func.func @transform_1(%arg0: i32) -> (i32, i32) {
    %c0_i32 = arith.constant 0 : i32
    %c0_i32_0 = arith.constant 0 : i32
    %c0_i32_1 = arith.constant 0 : i32
    return %c0_i32, %c0_i32_0 : i32, i32
  }
  func.func @transform_2(%arg0: i32) -> (i32, i32) {
    %c0_i32 = arith.constant 0 : i32
    %c0_i32_0 = arith.constant 0 : i32
    %c0_i32_1 = arith.constant 0 : i32
    return %c0_i32, %c0_i32_0 : i32, i32
  }
  func.func @transform_3(%arg0: i32) -> (i32, i32) {
    %c0_i32 = arith.constant 0 : i32
    %c0_i32_0 = arith.constant 0 : i32
    %c0_i32_1 = arith.constant 0 : i32
    return %c0_i32, %c0_i32_0 : i32, i32
  }
  func.func @transform_4(%arg0: i32) -> (i32, i32) {
    %c0_i32 = arith.constant 0 : i32
    %c0_i32_0 = arith.constant 0 : i32
    %c0_i32_1 = arith.constant 0 : i32
    return %c0_i32, %c0_i32_0 : i32, i32
  }
  func.func @transform_5(%arg0: i32) -> (i32, i32) {
    %c0_i32 = arith.constant 0 : i32
    %c0_i32_0 = arith.constant 0 : i32
    %c0_i32_1 = arith.constant 0 : i32
    return %c0_i32, %c0_i32_0 : i32, i32
  }
  func.func @transform_6(%arg0: i32) -> (i32, i32) {
    %c0_i32 = arith.constant 0 : i32
    %c0_i32_0 = arith.constant 0 : i32
    %c0_i32_1 = arith.constant 0 : i32
    return %c0_i32, %c0_i32_0 : i32, i32
  }
  func.func @transform_7(%arg0: i32) -> (i32, i32) {
    %c0_i32 = arith.constant 0 : i32
    %c0_i32_0 = arith.constant 0 : i32
    %c0_i32_1 = arith.constant 0 : i32
    return %c0_i32, %c0_i32_0 : i32, i32
  }
  func.func @transform_8(%arg0: i32) -> (i32, i32) {
    %c0_i32 = arith.constant 0 : i32
    %c0_i32_0 = arith.constant 0 : i32
    %c0_i32_1 = arith.constant 0 : i32
    return %c0_i32, %c0_i32_0 : i32, i32
  }
  func.func @transform_9(%arg0: i32) -> (i32, i32) {
    %c0_i32 = arith.constant 0 : i32
    %c0_i32_0 = arith.constant 0 : i32
    %c0_i32_1 = arith.constant 0 : i32
    return %c0_i32, %c0_i32_0 : i32, i32
  }
  func.func @transform_10(%arg0: i32) -> (i32, i32) {
    %c0_i32 = arith.constant 0 : i32
    %c0_i32_0 = arith.constant 0 : i32
    %c0_i32_1 = arith.constant 0 : i32
    return %c0_i32, %c0_i32_0 : i32, i32
  }
  func.func @transform_11(%arg0: i32) -> (i32, i32) {
    %c0_i32 = arith.constant 0 : i32
    %c0_i32_0 = arith.constant 0 : i32
    %c0_i32_1 = arith.constant 0 : i32
    return %c0_i32, %c0_i32_0 : i32, i32
  }
  func.func @transform_12(%arg0: i32) -> (i32, i32) {
    %c0_i32 = arith.constant 0 : i32
    %c0_i32_0 = arith.constant 0 : i32
    %c0_i32_1 = arith.constant 0 : i32
    return %c0_i32, %c0_i32_0 : i32, i32
  }
  func.func @transform_13(%arg0: i32) -> (i32, i32) {
    %c0_i32 = arith.constant 0 : i32
    %c0_i32_0 = arith.constant 0 : i32
    %c0_i32_1 = arith.constant 0 : i32
    return %c0_i32, %c0_i32_0 : i32, i32
  }
  func.func @transform_14(%arg0: i32) -> (i32, i32) {
    %c0_i32 = arith.constant 0 : i32
    %c0_i32_0 = arith.constant 0 : i32
    %c0_i32_1 = arith.constant 0 : i32
    return %c0_i32, %c0_i32_0 : i32, i32
  }
  func.func @transform_15(%arg0: i32) -> (i32, i32) {
    %c0_i32 = arith.constant 0 : i32
    %c0_i32_0 = arith.constant 0 : i32
    return %arg0, %c0_i32 : i32, i32
  }
}

</mosaic_0001>

<bundles_post_ra>
// kernel: transformer_classifier.1
= control target key start
LH: loop header
LB: loop body
LE: loop exit
PB: predicated region body
PF: predicated region fallthrough
CT: control target
= control target key end

     0   :  { %vm58_vm0 = vcmask 261120   ;;  %s1525_s0 = inlined_call_operand.vmem [shape: bf16[2,8,32], index: 0, kind: input, shape index: {}]   ;;  %s1526_s1 = inlined_call_operand.vmem [shape: f32[1,32], index: 1, kind: input, shape index: {}]   ;;  %s1527_s2 = inlined_call_operand.vmem [shape: f32[1,32], index: 2, kind: input, shape index: {}]   ;;  %s1528_s3 = inlined_call_operand.vmem [shape: bf16[32,128], index: 3, kind: input, shape index: {}]   ;;  %s1529_s4 = inlined_call_operand.vmem [shape: f32[1,32], index: 4, kind: input, shape index: {}]   ;;  %s1530_s5 = inlined_call_operand.vmem [shape: f32[1,32], index: 5, kind: input, shape index: {}]   ;;  %s1531_s6 = inlined_call_operand.vmem [shape: f32[1,32], index: 6, kind: input, shape index: {}]   ;;  %s1532_s7 = inlined_call_operand.vmem [shape: f32[1,32], index: 7, kind: input, shape index: {}]   ;;  %s1533_s8 = inlined_call_operand.vmem [shape: f32[1,32], index: 8, kind: input, shape index: {}]   ;;  %s1534_s9 = inlined_call_operand.vmem [shape: bf16[32,128], index: 9, kind: input, shape index: {}]   ;;  %s1535_s10 = inlined_call_operand.vmem [shape: f32[1,128], index: 10, kind: input, shape index: {}]   ;;  %s1536_s11 = inlined_call_operand.vmem [shape: bf16[128,32], index: 11, kind: input, shape index: {}]   ;;  %s1537_s12 = inlined_call_operand.vmem [shape: f32[1,32], index: 12, kind: input, shape index: {}]   ;;  %s1538_s13 = inlined_call_operand.vmem [shape: bf16[32,128], index: 13, kind: input, shape index: {}]   ;;  %s1539_s14 = inlined_call_operand.vmem [shape: f32[1,128], index: 14, kind: input, shape index: {}]   ;;  %s1540_s15 = inlined_call_operand.hbm [shape: f32[2,128], index: 15, kind: output, shape index: {}]  }
   0x1   :  { %v1036_v0 = vld [vmem:[%s1525_s0] sm:$0xff]  }
   0x2   :  { %v1037_v1 = vunpack.c.l.bf16 %v1036_v0  ;;  %v1038_v2 = vunpack.c.h.bf16 %v1036_v0 }
   0x4   :  { %v59_v3 = vsel %vm58_vm0, %v1037_v1, 0.0  ;;  %v62_v4 = vsel %vm58_vm0, %v1038_v2, 0.0 }
   0x5   :  { %60 = vadd.xlane.f32.xlu0 %v59_v3 }
   0x9   :  { %63 = vadd.xlane.f32.xlu0 %v62_v4 }
   0xa   :  { %20 = vsyncpa [#allocation3], 0  ;;  %v1173_v15 = vld [vmem:[%s1528_s3] sm:$0xff]   ;;  %v1239_v16 = vmov 0.0   ;;  %v1174_v17 = vld [vmem:[%s1528_s3 + $0x8] sm:$0xff]   ;;  %vm1240_vm1 = vmmov 0  }
   0xb   :  { %1073 = vmatprep.subr.bf16.mxu1 %v1239_v16  ;;  %1087 = vmatprep.subr.bf16.mxu0 %v1239_v16  ;;  %v996_v26 = vld [vmem:[%s1526_s1] ss:$0 sm:$0xff]  ;;  %s1241_s1 = smov 96   ;;  %s1243_s26 = smov 80   ;;  %vm171_vm2 = vcmask 130048   ;;  %vm266_vm3 = vcmask 64512  }
   0xc   :  { %1074 = vmatpush3.bf16.msra.mxu1 %v1173_v15  ;;  %1077 = vmatprep.mubr.msk.bf16.mxu1 %vm1240_vm1, %v1239_v16  ;;  %v997_v30 = vld [vmem:[%s1527_s2] ss:$0 sm:$0xff]  ;;  %s1242_s2 = smov 112   ;;  %s1244_s27 = smov 32   ;;  %vm420_vm4 = vcmask 1043456   ;;  %vm923_vm5 = vcmask 1041409  }
   0xd   :  { %1075 = vmatprep.subr.bf16.mxu1 %v1239_v16  ;;  %1089 = vmatprep.mubr.msk.bf16.mxu0 %vm1240_vm1, %v1239_v16  ;;  %s1245_s28 = smov 64   ;;  %s1246_s3 = smov [#allocation2]  }
  0x10   :  { %1076 = vmatpush3.bf16.msra.mxu1 %v1174_v17 }
  0x11   :  { %1081 = vmatprep.subr.bf16.mxu1 %v1239_v16 }
  0x92   :  { %v61_v5 = vpop.xlane.xlu0 %60 }
  0x93   :  { %v66_v6 = vmul.f32 0.03125, %v61_v5 }
  0x95   :  { %v68_v7 = vsub.f32 %v1037_v1, %v66_v6 }
  0x96   :  { %v64_v8 = vpop.xlane.xlu0 %63 }
  0x97   :  { %v67_v9 = vmul.f32 0.03125, %v64_v8  ;;  %v70_v10 = vmul.f32 %v68_v7, %v68_v7 }
  0x99   :  { %v69_v11 = vsub.f32 %v1038_v2, %v67_v9  ;;  %v72_v12 = vsel %vm58_vm0, %v70_v10, 0.0 }
  0x9a   :  { %73 = vadd.xlane.f32.xlu1 %v72_v12 }
  0x9b   :  { %v71_v13 = vmul.f32 %v69_v11, %v69_v11 }
  0x9d   :  { %v75_v14 = vsel %vm58_vm0, %v71_v13, 0.0 }
  0x9e   :  { %76 = vadd.xlane.f32.xlu1 %v75_v14 }
 0x127   :  { %v74_v18 = vpop.xlane.xlu1 %73 }
 0x128   :  { %v78_v19 = vmul.f32 0.03125, %v74_v18 }
 0x12a   :  { %v80_v20 = vadd.f32 1e-12, %v78_v19 }
 0x12b   :  { %v77_v21 = vpop.xlane.xlu1 %76 }
 0x12c   :  { %1187 = vrsqrt.f32 %v80_v20  ;;  %v79_v22 = vmul.f32 0.03125, %v77_v21 }
 0x12e   :  { %v81_v23 = vadd.f32 1e-12, %v79_v22 }
 0x130   :  { %1189 = vrsqrt.f32 %v81_v23 }
 0x136   :  { %v1188_v24 = vpop.eup %1187 }
 0x137   :  { %v84_v25 = vmul.f32 %v1188_v24, %v68_v7 }
 0x139   :  { %v92_v29 = vmul.f32 %v996_v26, %v84_v25 }
 0x13a   :  { %v1190_v27 = vpop.eup %1189 }
 0x13b   :  { %v85_v28 = vmul.f32 %v1190_v27, %v69_v11  ;;  %v1354_v32 = vadd.f32 %v997_v30, %v92_v29 }
 0x13d   :  { %v93_v31 = vmul.f32 %v996_v26, %v85_v28 }
 0x13f   :  { %v1356_v33 = vadd.f32 %v997_v30, %v93_v31 }
 0x141   :  { %v102_v34 = vpack.c.bf16 %v1356_v33, %v1354_v32 }
 0x143   :  { %1078 = vmatmul.mubr.msk.bf16.vlgmr.msra.gmra.mrb[0].mxu1 %vm58_vm0, %v102_v34 }
 0x144   :  { %1083 = vmatprep.mubr.msk.bf16.mxu1 %vm1240_vm1, %v1239_v16 }
 0x216   :  { %v156_v35 = vpop.f32.mrb[0].mxu1 }
 0x217   :  { %v1363_v36 = vpack.c.bf16 %v156_v35, %v156_v35  ;;  %v1079_v37 = vpop.f32.mrb[1].mxu1 }
 0x218   :  { %v159_v38 = vpop.f32.mrb[2].mxu1 }
 0x219   :  { %v1365_v39 = vpack.c.bf16 %v159_v38, %v159_v38  ;;  %169 = vrot.lane.b32.xlu0 %v1363_v36, %s1241_s1  ;;  %v1080_v40 = vpop.f32.mrb[3].mxu1 }
 0x21b   :  { %218 = vrot.lane.b32.xlu1 %v1365_v39, %s1241_s1 }
 0x21d   :  { %291 = vrot.lane.b32.xlu0 %v1363_v36, %s1242_s2 }
 0x21f   :  { %293 = vrot.lane.b32.xlu1 %v1363_v36, %s1243_s26 }
 0x223   :  { %343 = vrot.lane.b32.xlu1 %v1365_v39, %s1243_s26 }
 0x227   :  { %341 = vrot.lane.b32.xlu1 %v1365_v39, %s1242_s2 }
 0x28b   :  { %v170_v41 = vpop.permute.xlu0 %169 }
 0x28c   :  { %v176_v42 = vsel %vm171_vm2, %v170_v41, 0 }
 0x28d   :  { %1082 = vmatpush3.bf16.xpose.msra.mxu1 %v176_v42  ;;  %v219_v43 = vpop.permute.xlu1 %218 }
 0x28e   :  { %v224_v44 = vsel %vm171_vm2, %v219_v43, 0  ;;  %1093 = vmatprep.subr.bf16.mxu1 %v1239_v16 }
 0x28f   :  { %1088 = vmatpush3.bf16.xpose.msra.mxu0 %v224_v44  ;;  %v292_v49 = vpop.permute.xlu0 %291 }
 0x290   :  { %1099 = vmatprep.subr.bf16.mxu0 %v1239_v16 }
 0x291   :  { %v294_v45 = vpop.permute.xlu1 %293 }
 0x292   :  { %v299_v46 = vsel %vm171_vm2, %v294_v45, 0 }
 0x294   :  { %1084 = vmatmul.mubr.msk.bf16.vlgmr.msra.gmra.mrb[4].mxu1 %vm171_vm2, %v1363_v36 }
 0x295   :  { %1094 = vmatpush3.bf16.xpose.msra.mxu1 %v299_v46  ;;  %v344_v47 = vpop.permute.xlu1 %343  ;;  %1095 = vmatprep.mubr.msk.bf16.mxu1 %vm1240_vm1, %v1239_v16 }
 0x296   :  { %v349_v48 = vsel %vm171_vm2, %v344_v47, 0  ;;  %1090 = vmatmul.mubr.msk.bf16.vlgmr.msra.gmra.mrb[0].mxu0 %vm171_vm2, %v1365_v39  ;;  %1105 = vmatprep.subr.bf16.mxu1 %v1239_v16 }
 0x297   :  { %1100 = vmatpush3.bf16.xpose.msra.mxu0 %v349_v48  ;;  %1101 = vmatprep.mubr.msk.bf16.mxu0 %vm1240_vm1, %v1239_v16 }
 0x298   :  { %1111 = vmatprep.subr.bf16.mxu0 %v1239_v16 }
 0x299   :  { %v342_v50 = vpop.permute.xlu1 %341 }
 0x29c   :  { %1096 = vmatmul.mubr.msk.bf16.vlgmr.msra.gmra.mrb[8].mxu1 %vm171_vm2, %v292_v49 }
 0x29d   :  { %1107 = vmatprep.mubr.msk.bf16.mxu1 %vm1240_vm1, %v1239_v16 }
 0x29e   :  { %1102 = vmatmul.mubr.msk.bf16.vlgmr.msra.gmra.mrb[4].mxu0 %vm171_vm2, %v342_v50 }
 0x29f   :  { %1113 = vmatprep.mubr.msk.bf16.mxu0 %vm1240_vm1, %v1239_v16 }
 0x367   :  { %v212_v51 = vpop.f32.mrb[4].mxu1 }
 0x368   :  { %v1085_v52 = vpop.f32.mrb[5].mxu1  ;;  %v267_v5 = vsel %vm266_vm3, %v212_v51, -inf }
 0x369   :  { %v215_v53 = vpop.f32.mrb[6].mxu1  ;;  %v260_v54 = vpop.f32.mrb[0].mxu0 }
 0x36a   :  { %v1086_v55 = vpop.f32.mrb[7].mxu1  ;;  %v1091_v56 = vpop.f32.mrb[1].mxu0  ;;  %v270_v6 = vsel %vm266_vm3, %v260_v54, -inf }
 0x36b   :  { %v263_v57 = vpop.f32.mrb[2].mxu0 }
 0x36c   :  { %v1092_v58 = vpop.f32.mrb[3].mxu0 }
 0x36f   :  { %v335_v59 = vpop.f32.mrb[8].mxu1 }
 0x370   :  { %v1097_v60 = vpop.f32.mrb[9].mxu1  ;;  %v391_v61 = vsel %vm266_vm3, %v335_v59, -inf }
 0x371   :  { %v385_v62 = vpop.f32.mrb[4].mxu0  ;;  %392 = vmax.xlane.f32.xlu0 %v391_v61  ;;  %v338_v63 = vpop.f32.mrb[10].mxu1 }
 0x372   :  { %v1098_v0 = vpop.f32.mrb[11].mxu1  ;;  %v1103_v1 = vpop.f32.mrb[5].mxu0  ;;  %v394_v2 = vsel %vm266_vm3, %v385_v62, -inf }
 0x373   :  { %395 = vmax.xlane.f32.xlu1 %v394_v2  ;;  %v388_v3 = vpop.f32.mrb[6].mxu0 }
 0x374   :  { %v1104_v4 = vpop.f32.mrb[7].mxu0 }
 0x375   :  { %268 = vmax.xlane.f32.xlu0 %v267_v5 }
 0x379   :  { %271 = vmax.xlane.f32.xlu0 %v270_v6 }
 0x3fe   :  { %v393_v7 = vpop.xlane.xlu0 %392 }
 0x3ff   :  { %v397_v8 = vsub.f32 %v335_v59, %v393_v7  ;;  %v1011_v59 = vld [vmem:[%s1529_s4] ss:$0 sm:$0xff] }
 0x400   :  { %v396_v23 = vpop.xlane.xlu1 %395 }
 0x401   :  { %v399_v11 = vmul.f32 1.442695, %v397_v8  ;;  %v398_v24 = vsub.f32 %v385_v62, %v396_v23 }
 0x402   :  { %v269_v9 = vpop.xlane.xlu0 %268 }
 0x403   :  { %v273_v10 = vsub.f32 %v212_v51, %v269_v9  ;;  %v401_v25 = vmul.f32 1.442695, %v398_v24 }
 0x405   :  { %v275_v12 = vmul.f32 1.442695, %v273_v10 }
 0x406   :  { %v272_v13 = vpop.xlane.xlu0 %271 }
 0x407   :  { %1191 = vpow2.f32 %v275_v12  ;;  %v274_v14 = vsub.f32 %v260_v54, %v272_v13 }
 0x408   :  { %1193 = vpow2.f32 %v399_v11 }
 0x409   :  { %v277_v15 = vmul.f32 1.442695, %v274_v14 }
 0x40b   :  { %1195 = vpow2.f32 %v277_v15 }
 0x40c   :  { %1197 = vpow2.f32 %v401_v25  ;;  %v1176_v25 = vld [vmem:[%s1534_s9 + $0x8] sm:$0xff]  }
 0x411   :  { %v1192_v17 = vpop.eup %1191 }
 0x412   :  { %v279_v18 = vsel %vm266_vm3, %v1192_v17, 0.0  ;;  %v1194_v19 = vpop.eup %1193 }
 0x413   :  { %280 = vadd.xlane.f32.xlu0 %v279_v18  ;;  %v403_v21 = vsel %vm266_vm3, %v1194_v19, 0.0 }
 0x415   :  { %v1196_v20 = vpop.eup %1195 }
 0x416   :  { %v282_v22 = vsel %vm266_vm3, %v1196_v20, 0.0  ;;  %v1198_v26 = vpop.eup %1197 }
 0x417   :  { %404 = vadd.xlane.f32.xlu0 %v403_v21  ;;  %283 = vadd.xlane.f32.xlu1 %v282_v22  ;;  %v406_v27 = vsel %vm266_vm3, %v1198_v26, 0.0 }
 0x428   :  { %464 = vrot.lane.b32.xlu1 %v1365_v39, %s1244_s27 }
 0x42c   :  { %512 = vrot.lane.b32.xlu1 %v1363_v36, %s1245_s28 }
 0x42d   :  { %415 = vrot.lane.b32.xlu0 %v1363_v36, %s1244_s27 }
 0x450   :  { %407 = vadd.xlane.f32.xlu1 %v406_v27  ;;  %v1178_v27 = vld [vmem:[%s1536_s11 + $0x8] sm:$0xff]  }
 0x461   :  { %560 = vrot.lane.b32.xlu1 %v1365_v39, %s1245_s28 }
 0x4a0   :  { %v281_v28 = vpop.xlane.xlu0 %280 }
 0x4a4   :  { %v284_v29 = vpop.xlane.xlu1 %283  ;;  %v405_v30 = vpop.xlane.xlu0 %404 }
 0x4a5   :  { %1199 = vrcp.f32 %v405_v30  ;;  %v1181_v30 = vld [vmem:[%s1536_s11 + $0x20] sm:$0xff]  }
 0x4a6   :  { %1201 = vrcp.f32 %v281_v28  ;;  %v1179_v28 = vld [vmem:[%s1536_s11 + $0x10] sm:$0xff]  }
 0x4a8   :  { %v465_v31 = vpop.permute.xlu1 %464  ;;  %v416_v34 = vpop.permute.xlu0 %415 }
 0x4a9   :  { %v470_v35 = vsel %vm420_vm4, %v465_v31, 0  ;;  %v422_v36 = vsel %vm420_vm4, %v416_v34, 0  ;;  %v1182_v31 = vld [vmem:[%s1536_s11 + $0x28] sm:$0xff]  }
 0x4aa   :  { %1106 = vmatpush3.bf16.msra.mxu1 %v422_v36  ;;  %1112 = vmatpush3.bf16.msra.mxu0 %v470_v35 }
 0x4ab   :  { %1117 = vmatprep.subr.bf16.mxu1 %v1239_v16  ;;  %1123 = vmatprep.subr.bf16.mxu0 %v1239_v16 }
 0x4ac   :  { %v513_v39 = vpop.permute.xlu1 %512 }
 0x4ad   :  { %v518_v42 = vsel %vm420_vm4, %v513_v39, 0 }
 0x4af   :  { %v1200_v37 = vpop.eup %1199 }
 0x4b0   :  { %v411_v38 = vmul.f32 %v1200_v37, %v1194_v19  ;;  %v1202_v41 = vpop.eup %1201 }
 0x4b1   :  { %v287_v43 = vmul.f32 %v1202_v41, %v1192_v17 }
 0x4b2   :  { %v413_v40 = vpack.c.bf16 %v411_v38, %v411_v38 }
 0x4b3   :  { %v289_v44 = vpack.c.bf16 %v287_v43, %v287_v43 }
 0x4b4   :  { %1108 = vmatmul.mubr.msk.bf16.vlgmr.msra.gmra.mrb[12].mxu1 %vm266_vm3, %v413_v40 }
 0x4b5   :  { %1118 = vmatpush3.bf16.msra.mxu1 %v518_v42  ;;  %1119 = vmatprep.mubr.msk.bf16.mxu1 %vm1240_vm1, %v1239_v16  ;;  %v1012_v42 = vld [vmem:[%s1530_s5] ss:$0 sm:$0xff] }
 0x4b6   :  { %1129 = vmatprep.subr.bf16.mxu1 %v1239_v16 }
 0x4bc   :  { %1120 = vmatmul.mubr.msk.bf16.vlgmr.msra.gmra.mrb[16].mxu1 %vm266_vm3, %v289_v44 }
 0x4bd   :  { %1133 = vmatprep.mubr.msk.bf16.mxu1 %vm1240_vm1, %v1239_v16 }
 0x4dd   :  { %v408_v45 = vpop.xlane.xlu1 %407 }
 0x4de   :  { %1203 = vrcp.f32 %v408_v45 }
 0x4df   :  { %1205 = vrcp.f32 %v284_v29  ;;  %v1180_v29 = vld [vmem:[%s1536_s11 + $0x18] sm:$0xff]  }
 0x4e1   :  { %v561_v48 = vpop.permute.xlu1 %560 }
 0x4e2   :  { %v566_v51 = vsel %vm420_vm4, %v561_v48, 0 }
 0x4e8   :  { %v1204_v46 = vpop.eup %1203 }
 0x4e9   :  { %v412_v47 = vmul.f32 %v1204_v46, %v1198_v26  ;;  %v1206_v50 = vpop.eup %1205  ;;  %v1177_v26 = vld [vmem:[%s1536_s11] sm:$0xff]  }
 0x4ea   :  { %v288_v52 = vmul.f32 %v1206_v50, %v1196_v20  ;;  %v1013_v46 = vld [vmem:[%s1531_s6] ss:$0 sm:$0xff] }
 0x4eb   :  { %v414_v49 = vpack.c.bf16 %v412_v47, %v412_v47 }
 0x4ec   :  { %v290_v53 = vpack.c.bf16 %v288_v52, %v288_v52  ;;  %v1184_v52 = vld [vmem:[%s1536_s11 + $0x38] sm:$0xff]  }
 0x4ed   :  { %1114 = vmatmul.mubr.msk.bf16.vlgmr.msra.gmra.mrb[8].mxu0 %vm266_vm3, %v414_v49 }
 0x4ee   :  { %1124 = vmatpush3.bf16.msra.mxu0 %v566_v51  ;;  %1125 = vmatprep.mubr.msk.bf16.mxu0 %vm1240_vm1, %v1239_v16  ;;  %v1183_v51 = vld [vmem:[%s1536_s11 + $0x30] sm:$0xff]  }
 0x4ef   :  { %1137 = vmatprep.subr.bf16.mxu0 %v1239_v16 }
 0x4f5   :  { %1126 = vmatmul.mubr.msk.bf16.vlgmr.msra.gmra.mrb[12].mxu0 %vm266_vm3, %v290_v53  ;;  %v1014_v53 = vld [vmem:[%s1535_s10] ss:$0 sm:$0xff] }
 0x4f6   :  { %1153 = vmatprep.mubr.msk.bf16.mxu0 %vm1240_vm1, %v1239_v16  ;;  %1138 = vmatpush3.bf16.msra.mxu0 %v1177_v26 }
 0x4f7   :  { %1139 = vmatprep.subr.bf16.mxu0 %v1239_v16 }
 0x4fa   :  { %1140 = vmatpush3.bf16.msra.mxu0 %v1178_v27 }
 0x4fb   :  { %1141 = vmatprep.subr.bf16.mxu0 %v1239_v16 }
 0x4fe   :  { %1142 = vmatpush3.bf16.msra.mxu0 %v1179_v28  ;;  %v1027_v28 = vld [vmem:[%s1532_s7] ss:$0 sm:$0xff] }
 0x4ff   :  { %1143 = vmatprep.subr.bf16.mxu0 %v1239_v16 }
 0x502   :  { %1144 = vmatpush3.bf16.msra.mxu0 %v1180_v29 }
 0x503   :  { %1145 = vmatprep.subr.bf16.mxu0 %v1239_v16 }
 0x506   :  { %1146 = vmatpush3.bf16.msra.mxu0 %v1181_v30 }
 0x507   :  { %1147 = vmatprep.subr.bf16.mxu0 %v1239_v16 }
 0x50a   :  { %1148 = vmatpush3.bf16.msra.mxu0 %v1182_v31 }
 0x50b   :  { %1149 = vmatprep.subr.bf16.mxu0 %v1239_v16 }
 0x50e   :  { %1150 = vmatpush3.bf16.msra.mxu0 %v1183_v51 }
 0x50f   :  { %1151 = vmatprep.subr.bf16.mxu0 %v1239_v16 }
 0x512   :  { %1152 = vmatpush3.bf16.msra.mxu0 %v1184_v52 }
 0x587   :  { %v458_v54 = vpop.f32.mrb[12].mxu1 }
 0x588   :  { %v1109_v55 = vpop.f32.mrb[13].mxu1 }
 0x589   :  { %v461_v56 = vpop.f32.mrb[14].mxu1 }
 0x58a   :  { %v1110_v57 = vpop.f32.mrb[15].mxu1 }
 0x58f   :  { %v554_v58 = vpop.f32.mrb[16].mxu1 }
 0x590   :  { %v555_v60 = vadd.f32 %v554_v58, %v458_v54  ;;  %v1121_v61 = vpop.f32.mrb[17].mxu1 }
 0x591   :  { %v557_v62 = vpop.f32.mrb[18].mxu1 }
 0x592   :  { %v615_v63 = vadd.f32 %v1011_v59, %v555_v60  ;;  %v1122_v0 = vpop.f32.mrb[19].mxu1 }
 0x594   :  { %v617_v1 = vadd.f32 %v615_v63, %v1354_v32  ;;  %v1018_v63 = vld [vmem:[%s1537_s12] ss:$0 sm:$0xff] }
 0x596   :  { %v621_v2 = vsel %vm58_vm0, %v617_v1, 0.0 }
 0x597   :  { %622 = vadd.xlane.f32.xlu0 %v621_v2 }
 0x5c0   :  { %v506_v3 = vpop.f32.mrb[8].mxu0 }
 0x5c1   :  { %v1115_v4 = vpop.f32.mrb[9].mxu0 }
 0x5c2   :  { %v509_v5 = vpop.f32.mrb[10].mxu0 }
 0x5c3   :  { %v1116_v6 = vpop.f32.mrb[11].mxu0 }
 0x5c8   :  { %v602_v7 = vpop.f32.mrb[12].mxu0 }
 0x5c9   :  { %v603_v8 = vadd.f32 %v602_v7, %v506_v3  ;;  %v1127_v9 = vpop.f32.mrb[13].mxu0 }
 0x5ca   :  { %v605_v10 = vpop.f32.mrb[14].mxu0 }
 0x5cb   :  { %v616_v11 = vadd.f32 %v1011_v59, %v603_v8  ;;  %v1128_v12 = vpop.f32.mrb[15].mxu0 }
 0x5cd   :  { %v618_v13 = vadd.f32 %v616_v11, %v1356_v33  ;;  %v1175_v33 = vld [vmem:[%s1534_s9] sm:$0xff]   ;;  %s988_s9 = sshll.u32 %s1246_s3, 4  ;;  %s989_s9 = int_to_ptr.vmem [resolvable:$true] %s988_s9 }
 0x5ce   :  { %1130 = vmatpush3.bf16.msra.mxu1 %v1175_v33  ;;  %s1215_s23 = scalar_lea.vmem %s989_s9, 32  ;;  %p1220_p1 = scmp.lt.s32.totalorder %s989_s9, %s989_s9 }
 0x5cf   :  { %v624_v14 = vsel %vm58_vm0, %v618_v13, 0.0  ;;  %1131 = vmatprep.subr.bf16.mxu1 %v1239_v16  ;;  %p1216_p0 = scmp.ne.s32.totalorder %s989_s9, %s1215_s23  ;;  %p1221_p2 = scmp.lt.s32.totalorder %s1215_s23, %s1215_s23 }
 0x5d0   :  { %625 = vadd.xlane.f32.xlu1 %v624_v14 }
 0x5d1   :  { %p1222_p3 = por %p1221_p2, %p1220_p1 }
 0x5d2   :  { %1132 = vmatpush3.bf16.msra.mxu1 %v1176_v25 }
 0x5d3   :  { %1157 = vmatprep.subr.bf16.mxu1 %v1239_v16  ;;  %p1223_p4 = pnand %p1222_p3, %p1216_p0 }
 0x624   :  { %v623_v15 = vpop.xlane.xlu0 %622 }
 0x625   :  { %v627_v32 = vmul.f32 0.03125, %v623_v15 }
 0x627   :  { %v629_v17 = vsub.f32 %v617_v1, %v627_v32 }
 0x629   :  { %v631_v18 = vmul.f32 %v629_v17, %v629_v17 }
 0x62b   :  { %v633_v19 = vsel %vm58_vm0, %v631_v18, 0.0 }
 0x62c   :  { %634 = vadd.xlane.f32.xlu0 %v633_v19 }
 0x65d   :  { %v626_v20 = vpop.xlane.xlu1 %625 }
 0x65e   :  { %v628_v21 = vmul.f32 0.03125, %v626_v20  ;;  %v1185_v20 = vld [vmem:[%s1538_s13] sm:$0xff]  }
 0x660   :  { %v630_v22 = vsub.f32 %v618_v13, %v628_v21  ;;  %v1186_v21 = vld [vmem:[%s1538_s13 + $0x8] sm:$0xff]  }
 0x662   :  { %v632_v23 = vmul.f32 %v630_v22, %v630_v22 }
 0x664   :  { %v636_v24 = vsel %vm58_vm0, %v632_v23, 0.0 }
 0x665   :  { %637 = vadd.xlane.f32.xlu0 %v636_v24 }
 0x6b9   :  { %v635_v34 = vpop.xlane.xlu0 %634 }
 0x6ba   :  { %v639_v35 = vmul.f32 0.03125, %v635_v34 }
 0x6bc   :  { %v641_v36 = vadd.f32 1e-06, %v639_v35 }
 0x6be   :  { %1207 = vrsqrt.f32 %v641_v36 }
 0x6c8   :  { %v1208_v40 = vpop.eup %1207 }
 0x6c9   :  { %v645_v41 = vmul.f32 %v1208_v40, %v629_v17 }
 0x6cb   :  { %v653_v44 = vmul.f32 %v1012_v42, %v645_v41 }
 0x6cd   :  { %v661_v48 = vadd.f32 %v1013_v46, %v653_v44 }
 0x6f2   :  { %v638_v37 = vpop.xlane.xlu0 %637 }
 0x6f3   :  { %v640_v38 = vmul.f32 0.03125, %v638_v37 }
 0x6f5   :  { %v642_v39 = vadd.f32 1e-06, %v640_v38 }
 0x6f7   :  { %1209 = vrsqrt.f32 %v642_v39 }
 0x701   :  { %v1210_v43 = vpop.eup %1209 }
 0x702   :  { %v646_v45 = vmul.f32 %v1210_v43, %v630_v22 }
 0x704   :  { %v654_v47 = vmul.f32 %v1012_v42, %v646_v45 }
 0x706   :  { %v662_v49 = vadd.f32 %v1013_v46, %v654_v47 }
 0x708   :  { %v663_v50 = vpack.c.bf16 %v662_v49, %v661_v48 }
 0x70a   :  { %1134 = vmatmul.mubr.msk.bf16.vlgmr.msra.gmra.mrb[20].mxu1 %vm58_vm0, %v663_v50 }
 0x70b   :  { %1161 = vmatprep.mubr.msk.bf16.mxu1 %vm1240_vm1, %v1239_v16  ;;  %1158 = vmatpush3.bf16.msra.mxu1 %v1185_v20 }
 0x70c   :  { %1159 = vmatprep.subr.bf16.mxu1 %v1239_v16  ;;  %v1028_v16 = vld [vmem:[%s1533_s8] ss:$0 sm:$0xff] }
 0x70f   :  { %1160 = vmatpush3.bf16.msra.mxu1 %v1186_v21 }
 0x7dd   :  { %v724_v54 = vpop.f32.mrb[20].mxu1 }
 0x7de   :  { %v725_v55 = vadd.f32 %v1014_v53, %v724_v54  ;;  %v1135_v56 = vpop.f32.mrb[21].mxu1 }
 0x7df   :  { %v727_v57 = vpop.f32.mrb[22].mxu1 }
 0x7e0   :  { %v728_v58 = vadd.f32 %v1014_v53, %v727_v57  ;;  %v1136_v59 = vpop.f32.mrb[23].mxu1  ;;  %v731_v60 = vmax.f32 %v725_v55, 0.0 }
 0x7e2   :  { %v732_v61 = vmax.f32 %v728_v58, 0.0  ;;  %v1029_v58 = vld [vmem:[%s1539_s14] ss:$0 sm:$0xff] }
 0x7e4   :  { %v733_v62 = vpack.c.bf16 %v732_v61, %v731_v60 }
 0x7e6   :  { %1154 = vmatmul.mubr.bf16.vlgmr.msra.gmra.mrb[16].mxu0 %v733_v62 }
 0x8b9   :  { %v839_v0 = vpop.f32.mrb[16].mxu0 }
 0x8ba   :  { %v840_v1 = vadd.f32 %v1018_v63, %v839_v0  ;;  %v1155_v2 = vpop.f32.mrb[17].mxu0 }
 0x8bb   :  { %v842_v3 = vpop.f32.mrb[18].mxu0 }
 0x8bc   :  { %v843_v4 = vadd.f32 %v1018_v63, %v842_v3  ;;  %v1156_v5 = vpop.f32.mrb[19].mxu0  ;;  %v846_v6 = vadd.f32 %v840_v1, %v661_v48 }
 0x8be   :  { %v850_v7 = vsel %vm58_vm0, %v846_v6, 0.0  ;;  %v847_v8 = vadd.f32 %v843_v4, %v662_v49 }
 0x8bf   :  { %851 = vadd.xlane.f32.xlu0 %v850_v7 }
 0x8c0   :  { %v853_v9 = vsel %vm58_vm0, %v847_v8, 0.0 }
 0x8c1   :  { %854 = vadd.xlane.f32.xlu1 %v853_v9 }
 0x94c   :  { %v852_v10 = vpop.xlane.xlu0 %851 }
 0x94d   :  { %v856_v11 = vmul.f32 0.03125, %v852_v10 }
 0x94e   :  { %v855_v12 = vpop.xlane.xlu1 %854 }
 0x94f   :  { %v858_v13 = vsub.f32 %v846_v6, %v856_v11  ;;  %v857_v14 = vmul.f32 0.03125, %v855_v12 }
 0x951   :  { %v859_v15 = vsub.f32 %v847_v8, %v857_v14  ;;  %v860_v32 = vmul.f32 %v858_v13, %v858_v13 }
 0x953   :  { %v862_v17 = vsel %vm58_vm0, %v860_v32, 0.0  ;;  %v861_v18 = vmul.f32 %v859_v15, %v859_v15 }
 0x954   :  { %863 = vadd.xlane.f32.xlu0 %v862_v17 }
 0x955   :  { %v865_v19 = vsel %vm58_vm0, %v861_v18, 0.0 }
 0x956   :  { %866 = vadd.xlane.f32.xlu1 %v865_v19 }
 0x9e1   :  { %v864_v22 = vpop.xlane.xlu0 %863 }
 0x9e2   :  { %v868_v23 = vmul.f32 0.03125, %v864_v22 }
 0x9e3   :  { %v867_v24 = vpop.xlane.xlu1 %866 }
 0x9e4   :  { %v870_v33 = vadd.f32 1e-06, %v868_v23  ;;  %v869_v25 = vmul.f32 0.03125, %v867_v24 }
 0x9e6   :  { %1211 = vrsqrt.f32 %v870_v33  ;;  %v871_v26 = vadd.f32 1e-06, %v869_v25 }
 0x9e8   :  { %1213 = vrsqrt.f32 %v871_v26 }
 0x9f0   :  { %v1212_v27 = vpop.eup %1211 }
 0x9f1   :  { %v874_v29 = vmul.f32 %v1212_v27, %v858_v13 }
 0x9f2   :  { %v1214_v30 = vpop.eup %1213 }
 0x9f3   :  { %v882_v31 = vmul.f32 %v1027_v28, %v874_v29  ;;  %v875_v34 = vmul.f32 %v1214_v30, %v859_v15 }
 0x9f5   :  { %v890_v35 = vadd.f32 %v1028_v16, %v882_v31  ;;  %v883_v36 = vmul.f32 %v1027_v28, %v875_v34 }
 0x9f7   :  { %v892_v37 = vsel %vm58_vm0, %v890_v35, -inf  ;;  %v891_v38 = vadd.f32 %v1028_v16, %v883_v36 }
 0x9f8   :  { %v893_v39 = vrot.slane %v892_v37, 4 }
 0x9f9   :  { %v899_v40 = vsel %vm58_vm0, %v891_v38, -inf }
 0x9fa   :  { %v894_v41 = vmax.f32 %v892_v37, %v893_v39  ;;  %v900_v42 = vrot.slane %v899_v40, 4 }
 0x9fc   :  { %v895_v43 = vrot.slane %v894_v41, 2  ;;  %v901_v44 = vmax.f32 %v899_v40, %v900_v42 }
 0x9fe   :  { %v902_v45 = vrot.slane %v901_v44, 2  ;;  %v896_v46 = vmax.f32 %v894_v41, %v895_v43 }
 0xa00   :  { %v897_v47 = vrot.slane %v896_v46, 1  ;;  %v903_v48 = vmax.f32 %v901_v44, %v902_v45 }
 0xa02   :  { %v898_v49 = vmax.f32 %v896_v46, %v897_v47  ;;  %v904_v50 = vrot.slane %v903_v48, 1 }
 0xa04   :  { %v905_v51 = vmax.f32 %v903_v48, %v904_v50  ;;  %v906_v52 = vpack.c.bf16 %v898_v49, %v898_v49 }
 0xa06   :  { %v907_v53 = vpack.c.bf16 %v905_v51, %v905_v51  ;;  %v921_v54 = vunpack.c.l.b16 %v906_v52 }
 0xa08   :  { %v922_v55 = vunpack.c.l.b16 %v907_v53 }
 0xa0a   :  { %v924_v56 = vsel %vm923_vm5, %v922_v55, %v921_v54 }
 0xa0b   :  { %v925_v57 = vpack.c.b16 %v924_v56, %v924_v56 }
 0xa0d   :  { %1162 = vmatmul.mubr.msk.bf16.vlgmr.msra.gmra.mrb[24].mxu1 %vm58_vm0, %v925_v57 }
 0xae0   :  { %v975_v59 = vpop.f32.mrb[24].mxu1 }
 0xae1   :  { %v976_v60 = vadd.f32 %v1029_v58, %v975_v59  ;;  %v1163_v61 = vpop.f32.mrb[25].mxu1 }
 0xae2   :  { %v978_v62 = vpop.f32.mrb[26].mxu1 }
 0xae3   :  { %981 = vst [vmem:[#allocation2] sm:$0x3] %v976_v60  ;;  %v1164_v63 = vpop.f32.mrb[27].mxu1 }
 0xae4   :  { %1226 = shalt.err (!%p1223_p4)
}
 0xae5   :  { %s1227_s14 = scalar_lea.hbm %s1540_s15, 32 }
 0xae6   :  { %p1228_p5 = scmp.ne.s32.totalorder %s1540_s15, %s1227_s14  ;;  %p1231_p6 = scmp.lt.u32.totalorder %s1227_s14, %s1540_s15 }
 0xae8   :  { %p1233_p7 = pnand %p1231_p6, %p1228_p5 }
 0xaea   :  { %1236 = shalt.err (!%p1233_p7)
}
 0xaeb   :  { %991 = dma.vmem_to_hbm [thread:$0]  %s989_s9, 32, %s1540_s15, [#allocation3]  }
 0xaec   :  { %1237 = dma.done.wait [#allocation3], 32  }
 0xaed   :  { %1238 = vsyncadd [#allocation3], 4294967264 }
 0xaee   :  { %995 = vsyncpa [#allocation3], 1 }

</bundles_post_ra>
